<compile_context>
chip_gen: v5e
topology: v5e:2x2
jax: 0.10.0
libtpu: 0.0.40
codegen_flags: <defaults>
</compile_context>

<pallas_src>
import functools

import jax
import jax.numpy as jnp
from jax.experimental import pallas as pl
from jax.experimental.pallas import tpu as pltpu


# ----------------------------------------------------------------------------
# Fused kernel: merged QKV projection + ReLU + horizontal-axis attention for
# one batch element.
#   x_ref     : (1, nf*C, CW)   rearranged input (see wrapper)
#   w_ref     : (3*H, nf*C)     expanded [Wq;Wk;Wv] block weights
#   gamma_ref : (1,) in SMEM
# outputs:
#   out_ref : (1, H, CW)  = gamma * (V^T @ A)^T   (lane-dense store)
#   att_ref : (1, H, H)   = softmax(Q@K^T, dim=1 of (B,H,H))
#   qh_ref  : (1, H, CW)  = x_Qh
#   kh_ref  : (1, H, CW)  = x_Kh^T  (wrapper transposes to (CW, H))
#   vh_ref  : (1, H, CW)  = x_Vh^T  (wrapper transposes to (CW, H))
# ----------------------------------------------------------------------------
def fused_axis_h_kernel(x_ref, w_ref, gamma_ref,
                        out_ref, att_ref, qh_ref, kh_ref, vh_ref, *, H):
    xr = x_ref[0]                                                  # (nf*C, CW)

    # Merged 1x1-conv-as-matmul for Q, K, V in one MXU push + single ReLU.
    # Lands directly in the (3H, CW) "view" layout — no relayout needed.
    qkv = jnp.dot(w_ref[...], xr, preferred_element_type=jnp.float32)
    qkv = jnp.maximum(qkv, 0.0)                                    # (3H, CW)

    # Static, sublane-aligned (H multiple of 8) row slices.
    Qh = qkv[0 * H:1 * H, :]
    Kh = qkv[1 * H:2 * H, :]
    Vh = qkv[2 * H:3 * H, :]

    # scores[i, j] = sum_d Q[i, d] K[j, d]        (== torch.matmul(Qh, Kh^T))
    scores = jax.lax.dot_general(
        Qh, Kh, (((1,), (1,)), ((), ())), preferred_element_type=jnp.float32)

    # softmax over dim=1 of the (B, H, H) tensor -> axis 0 of this (H, H) tile.
    m = jnp.max(scores, axis=0, keepdims=True)
    e = jnp.exp(scores - m)
    denom = jnp.sum(e, axis=0, keepdims=True)
    att = e * pl.reciprocal(denom)        # exact reciprocal (1e-5 check holds)

    # out1^T[j, d] = sum_i A[i, j] V[i, d]  -> (H, CW), lane-dense store.
    out_t = jax.lax.dot_general(
        att, Vh, (((0,), (0,)), ((), ())), preferred_element_type=jnp.float32)

    out_ref[0] = out_t * gamma_ref[0]
    att_ref[0] = att
    qh_ref[0] = Qh
    kh_ref[0] = Kh
    vh_ref[0] = Vh


# ----------------------------------------------------------------------------
# Wrapper
# ----------------------------------------------------------------------------
def _expand_weight(w, nf):
    """(Cr, C) conv weight -> (Cr*nf, nf*C) block weight so that the merged
    projection output is already in the torch `.view(B, H, -1)` layout."""
    Cr, C = w.shape
    eye = jnp.eye(nf, dtype=w.dtype)
    w4 = jnp.einsum("oc,fg->ofgc", w, eye)          # (Cr, nf, nf, C)
    return w4.reshape(Cr * nf, nf * C)


@jax.jit
def axis_horizontal_attention(x, wq, wk, wv, gamma):
    B, C, H, W = x.shape
    Cr = wq.shape[0]
    CW = Cr * W
    nf = (H * W) // CW                              # == H // Cr
    f32 = jnp.float32

    # Rearrange x once (tiny XLA transpose, ~8 KB) so the in-kernel matmul
    # produces Q/K/V directly in the (H, Cr*W) "view" layout.
    x_r = x.reshape(B, C, nf, CW).transpose(0, 2, 1, 3).reshape(B, nf * C, CW)

    w_all = jnp.concatenate(
        [_expand_weight(wq, nf), _expand_weight(wk, nf), _expand_weight(wv, nf)],
        axis=0)                                     # (3H, nf*C)

    kernel = functools.partial(fused_axis_h_kernel, H=H)

    out_t, att, qh, kh, vh = pl.pallas_call(
        kernel,
        out_shape=(
            jax.ShapeDtypeStruct((B, H, CW), f32),   # out1^T (lane-dense)
            jax.ShapeDtypeStruct((B, H, H), f32),    # attention weights
            jax.ShapeDtypeStruct((B, H, CW), f32),   # x_Qh
            jax.ShapeDtypeStruct((B, H, CW), f32),   # x_Kh^T
            jax.ShapeDtypeStruct((B, H, CW), f32),   # x_Vh^T
        ),
        grid=(B,),
        in_specs=[
            pl.BlockSpec((1, nf * C, CW), lambda b: (b, 0, 0)),
            pl.BlockSpec((3 * H, nf * C), lambda b: (0, 0)),
            pl.BlockSpec(memory_space=pltpu.MemorySpace.SMEM),
        ],
        out_specs=(
            pl.BlockSpec((1, H, CW), lambda b: (b, 0, 0)),
            pl.BlockSpec((1, H, H), lambda b: (b, 0, 0)),
            pl.BlockSpec((1, H, CW), lambda b: (b, 0, 0)),
            pl.BlockSpec((1, H, CW), lambda b: (b, 0, 0)),
            pl.BlockSpec((1, H, CW), lambda b: (b, 0, 0)),
        ),
        compiler_params=pltpu.CompilerParams(
            dimension_semantics=("parallel",)),       # one batch per TC on v7x
        cost_estimate=pl.CostEstimate(
            flops=B * (2 * 3 * H * (nf * C) * CW + 4 * H * H * CW),
            transcendentals=B * H * H,
            bytes_accessed=4 * (B * nf * C * CW + 3 * H * nf * C
                                + B * (4 * H * CW + H * H))),
    )(x_r, w_all, gamma)

    # x_Kh / x_Vh: tiny XLA transposes of already-materialized 4 KB tiles
    # (cheaper than in-kernel transposes with 16-lane masked stores).
    x_Kh = jnp.transpose(kh, (0, 2, 1))
    x_Vh = jnp.transpose(vh, (0, 2, 1))

    # out1 = V^T @ A ; kernel stored out1^T (lane-dense).  Final torch-faithful
    # view to (B, C, H, W) (requires ration == 1); gamma already applied.
    out_h = jnp.transpose(out_t, (0, 2, 1)).reshape(B, C, H, W)
    return out_h, qh, x_Kh, x_Vh, gamma, att


# ----------------------------------------------------------------------------
# Pure-JAX reference (mirrors the PyTorch forward exactly)
# ----------------------------------------------------------------------------
def reference(x, wq, wk, wv, gamma):
    B, C, H, W = x.shape
    relu = lambda z: jnp.maximum(z, 0.0)
    q = relu(jnp.einsum("oc,bchw->bohw", wq, x))
    k = relu(jnp.einsum("oc,bchw->bohw", wk, x))
    v = relu(jnp.einsum("oc,bchw->bohw", wv, x))
    Qh = q.reshape(B, H, -1)
    Kh = k.reshape(B, H, -1).transpose(0, 2, 1)
    Vh = v.reshape(B, H, -1).transpose(0, 2, 1)
    scores = jnp.einsum("bhd,bdj->bhj", Qh, Kh)
    att = jax.nn.softmax(scores, axis=1)
    out1 = jnp.einsum("bdh,bhj->bdj", Vh, att)
    out_h = out1.reshape(B, C, H, W) * gamma
    return out_h, Qh, Kh, Vh, gamma, att


if __name__ == "__main__":
    # Small shapes consistent with the module (ration must be 1, see NOTE).
    B, C, H, W = 2, 4, 16, 16
    ration = 1
    Cr = C // ration

    key = jax.random.PRNGKey(0)
    kx, kq, kk, kv = jax.random.split(key, 4)

    x = jax.random.normal(kx, (B, C, H, W), dtype=jnp.float32)
    # Conv2d(C, C//r, 1, bias=False) weights (C//r, C, 1, 1) kept squeezed.
    wq = 0.3 * jax.random.normal(kq, (Cr, C), dtype=jnp.float32)
    wk = 0.3 * jax.random.normal(kk, (Cr, C), dtype=jnp.float32)
    wv = 0.3 * jax.random.normal(kv, (Cr, C), dtype=jnp.float32)
    # gamma_h is nn.Parameter(torch.zeros(1)); use nonzero so the scaled path
    # is exercised.
    gamma = jnp.array([0.5], dtype=jnp.float32)

    outs = axis_horizontal_attention(x, wq, wk, wv, gamma)
    outs = jax.block_until_ready(outs)

    refs = reference(x, wq, wk, wv, gamma)

    names = ["out_h", "x_Qh", "x_Kh", "x_Vh", "gamma_h", "Attention_h_wight"]
    for name, got, want in zip(names, outs, refs):
        assert got.shape == want.shape, (name, got.shape, want.shape)
        assert jnp.allclose(got, want, rtol=1e-5, atol=1e-5), name

    print("KERNEL_OK")
</pallas_src>

<mosaic_0001>
module attributes {stable_mosaic.version = 11 : i64} {
  func.func @fused_axis_h_kernel(%arg0: i32, %arg1: memref<1x16x64xf32, #tpu.memory_space<vmem>>, %arg2: memref<48x16xf32, #tpu.memory_space<vmem>>, %arg3: memref<1xf32, #tpu.memory_space<smem>>, %arg4: memref<1x16x64xf32, #tpu.memory_space<vmem>>, %arg5: memref<1x16x16xf32, #tpu.memory_space<vmem>>, %arg6: memref<1x16x64xf32, #tpu.memory_space<vmem>>, %arg7: memref<1x16x64xf32, #tpu.memory_space<vmem>>, %arg8: memref<1x16x64xf32, #tpu.memory_space<vmem>>) attributes {dimension_semantics = [#tpu.dimension_semantics<parallel>], iteration_bounds = array<i64: 2>, scalar_prefetch = 0 : i64, scratch_operands = 0 : i64, tpu.core_type = #tpu.core_type<tc>, window_params = [{transform_indices = @transform_0, window_bounds = array<i64: 1, 16, 64>}, {pipeline_mode = #tpu.pipeline_mode<synchronous>, transform_indices = @transform_1, window_bounds = array<i64: 48, 16>}, {transform_indices = @transform_2, window_bounds = array<i64: 1>}, {transform_indices = @transform_3, window_bounds = array<i64: 1, 16, 64>}, {transform_indices = @transform_4, window_bounds = array<i64: 1, 16, 16>}, {transform_indices = @transform_5, window_bounds = array<i64: 1, 16, 64>}, {transform_indices = @transform_6, window_bounds = array<i64: 1, 16, 64>}, {transform_indices = @transform_7, window_bounds = array<i64: 1, 16, 64>}]} {
    %c0 = arith.constant 0 : index
    %c0_0 = arith.constant 0 : index
    %c0_1 = arith.constant 0 : index
    %0 = vector.load %arg1[%c0, %c0_0, %c0_1] : memref<1x16x64xf32, #tpu.memory_space<vmem>>, vector<1x16x64xf32>
    %1 = vector.shape_cast %0 : vector<1x16x64xf32> to vector<16x64xf32>
    %c0_2 = arith.constant 0 : index
    %c0_3 = arith.constant 0 : index
    %2 = vector.load %arg2[%c0_2, %c0_3] : memref<48x16xf32, #tpu.memory_space<vmem>>, vector<48x16xf32>
    %cst = arith.constant dense<0.000000e+00> : vector<48x64xf32>
    %3 = tpu.matmul %2, %1, %cst {dimension_numbers = #tpu.dot_dimension_numbers<[1], [0], [0], [1], [0, 0, 1, 1], [], []>} : vector<48x16xf32>, vector<16x64xf32>, vector<48x64xf32> -> vector<48x64xf32>
    %cst_4 = arith.constant 0.000000e+00 : f32
    %4 = vector.broadcast %cst_4 : f32 to vector<48x64xf32>
    %5 = arith.maximumf %3, %4 : vector<48x64xf32>
    %6 = vector.extract_strided_slice %5 {offsets = [0, 0], sizes = [16, 64], strides = [1, 1]} : vector<48x64xf32> to vector<16x64xf32>
    %7 = vector.extract_strided_slice %5 {offsets = [16, 0], sizes = [16, 64], strides = [1, 1]} : vector<48x64xf32> to vector<16x64xf32>
    %8 = vector.extract_strided_slice %5 {offsets = [32, 0], sizes = [16, 64], strides = [1, 1]} : vector<48x64xf32> to vector<16x64xf32>
    %cst_5 = arith.constant dense<0.000000e+00> : vector<16x16xf32>
    %9 = tpu.matmul %6, %7, %cst_5 {dimension_numbers = #tpu.dot_dimension_numbers<[1], [1], [0], [0], [0, 0, 1, 0], [], []>} : vector<16x64xf32>, vector<16x64xf32>, vector<16x16xf32> -> vector<16x16xf32>
    %cst_6 = arith.constant dense<0xFF800000> : vector<16xf32>
    %10 = vector.multi_reduction <maximumf>, %9, %cst_6 [0] : vector<16x16xf32> to vector<16xf32>
    %11 = vector.shape_cast %10 : vector<16xf32> to vector<1x16xf32>
    %12 = vector.broadcast %11 : vector<1x16xf32> to vector<16x16xf32>
    %13 = arith.subf %9, %12 : vector<16x16xf32>
    %14 = math.exp %13 : vector<16x16xf32>
    %cst_7 = arith.constant dense<0.000000e+00> : vector<16xf32>
    %15 = vector.multi_reduction <add>, %14, %cst_7 [0] : vector<16x16xf32> to vector<16xf32>
    %16 = vector.shape_cast %15 : vector<16xf32> to vector<1x16xf32>
    %17 = tpu.reciprocal %16 : vector<1x16xf32> -> vector<1x16xf32>
    %18 = vector.broadcast %17 : vector<1x16xf32> to vector<16x16xf32>
    %19 = arith.mulf %14, %18 : vector<16x16xf32>
    %cst_8 = arith.constant dense<0.000000e+00> : vector<16x64xf32>
    %20 = tpu.matmul %19, %8, %cst_8 {dimension_numbers = #tpu.dot_dimension_numbers<[0], [0], [1], [1], [0, 1, 1, 1], [], []>} : vector<16x16xf32>, vector<16x64xf32>, vector<16x64xf32> -> vector<16x64xf32>
    %c0_9 = arith.constant 0 : index
    %21 = memref.load %arg3[%c0_9] : memref<1xf32, #tpu.memory_space<smem>>
    %22 = vector.broadcast %21 : f32 to vector<16x64xf32>
    %23 = arith.mulf %20, %22 : vector<16x64xf32>
    %c0_10 = arith.constant 0 : index
    %c0_11 = arith.constant 0 : index
    %c0_12 = arith.constant 0 : index
    %24 = vector.load %arg4[%c0_10, %c0_11, %c0_12] : memref<1x16x64xf32, #tpu.memory_space<vmem>>, vector<1x16x64xf32>
    %25 = vector.shape_cast %24 : vector<1x16x64xf32> to vector<16x64xf32>
    %26 = vector.shape_cast %23 : vector<16x64xf32> to vector<1x16x64xf32>
    tpu.vector_store %arg4[%c0_10, %c0_11, %c0_12], %26 {strides = array<i32>} : memref<1x16x64xf32, #tpu.memory_space<vmem>>, vector<1x16x64xf32>,
    %c0_13 = arith.constant 0 : index
    %c0_14 = arith.constant 0 : index
    %c0_15 = arith.constant 0 : index
    %27 = vector.load %arg5[%c0_13, %c0_14, %c0_15] : memref<1x16x16xf32, #tpu.memory_space<vmem>>, vector<1x16x16xf32>
    %28 = vector.shape_cast %27 : vector<1x16x16xf32> to vector<16x16xf32>
    %29 = vector.shape_cast %19 : vector<16x16xf32> to vector<1x16x16xf32>
    tpu.vector_store %arg5[%c0_13, %c0_14, %c0_15], %29 {strides = array<i32>} : memref<1x16x16xf32, #tpu.memory_space<vmem>>, vector<1x16x16xf32>,
    %c0_16 = arith.constant 0 : index
    %c0_17 = arith.constant 0 : index
    %c0_18 = arith.constant 0 : index
    %30 = vector.load %arg6[%c0_16, %c0_17, %c0_18] : memref<1x16x64xf32, #tpu.memory_space<vmem>>, vector<1x16x64xf32>
    %31 = vector.shape_cast %30 : vector<1x16x64xf32> to vector<16x64xf32>
    %32 = vector.shape_cast %6 : vector<16x64xf32> to vector<1x16x64xf32>
    tpu.vector_store %arg6[%c0_16, %c0_17, %c0_18], %32 {strides = array<i32>} : memref<1x16x64xf32, #tpu.memory_space<vmem>>, vector<1x16x64xf32>,
    %c0_19 = arith.constant 0 : index
    %c0_20 = arith.constant 0 : index
    %c0_21 = arith.constant 0 : index
    %33 = vector.load %arg7[%c0_19, %c0_20, %c0_21] : memref<1x16x64xf32, #tpu.memory_space<vmem>>, vector<1x16x64xf32>
    %34 = vector.shape_cast %33 : vector<1x16x64xf32> to vector<16x64xf32>
    %35 = vector.shape_cast %7 : vector<16x64xf32> to vector<1x16x64xf32>
    tpu.vector_store %arg7[%c0_19, %c0_20, %c0_21], %35 {strides = array<i32>} : memref<1x16x64xf32, #tpu.memory_space<vmem>>, vector<1x16x64xf32>,
    %c0_22 = arith.constant 0 : index
    %c0_23 = arith.constant 0 : index
    %c0_24 = arith.constant 0 : index
    %36 = vector.load %arg8[%c0_22, %c0_23, %c0_24] : memref<1x16x64xf32, #tpu.memory_space<vmem>>, vector<1x16x64xf32>
    %37 = vector.shape_cast %36 : vector<1x16x64xf32> to vector<16x64xf32>
    %38 = vector.shape_cast %8 : vector<16x64xf32> to vector<1x16x64xf32>
    tpu.vector_store %arg8[%c0_22, %c0_23, %c0_24], %38 {strides = array<i32>} : memref<1x16x64xf32, #tpu.memory_space<vmem>>, vector<1x16x64xf32>,
    return
  }
  func.func @transform_0(%arg0: i32) -> (i32, i32, i32) {
    %c0_i32 = arith.constant 0 : i32
    %c0_i32_0 = arith.constant 0 : i32
    %c0_i32_1 = arith.constant 0 : i32
    return %arg0, %c0_i32, %c0_i32_0 : i32, i32, i32
  }
  func.func @transform_1(%arg0: i32) -> (i32, i32) {
    %c0_i32 = arith.constant 0 : i32
    %c0_i32_0 = arith.constant 0 : i32
    %c0_i32_1 = arith.constant 0 : i32
    return %c0_i32, %c0_i32_0 : i32, i32
  }
  func.func @transform_2(%arg0: i32) -> i32 {
    %c0_i32 = arith.constant 0 : i32
    %c0_i32_0 = arith.constant 0 : i32
    return %c0_i32 : i32
  }
  func.func @transform_3(%arg0: i32) -> (i32, i32, i32) {
    %c0_i32 = arith.constant 0 : i32
    %c0_i32_0 = arith.constant 0 : i32
    %c0_i32_1 = arith.constant 0 : i32
    return %arg0, %c0_i32, %c0_i32_0 : i32, i32, i32
  }
  func.func @transform_4(%arg0: i32) -> (i32, i32, i32) {
    %c0_i32 = arith.constant 0 : i32
    %c0_i32_0 = arith.constant 0 : i32
    %c0_i32_1 = arith.constant 0 : i32
    return %arg0, %c0_i32, %c0_i32_0 : i32, i32, i32
  }
  func.func @transform_5(%arg0: i32) -> (i32, i32, i32) {
    %c0_i32 = arith.constant 0 : i32
    %c0_i32_0 = arith.constant 0 : i32
    %c0_i32_1 = arith.constant 0 : i32
    return %arg0, %c0_i32, %c0_i32_0 : i32, i32, i32
  }
  func.func @transform_6(%arg0: i32) -> (i32, i32, i32) {
    %c0_i32 = arith.constant 0 : i32
    %c0_i32_0 = arith.constant 0 : i32
    %c0_i32_1 = arith.constant 0 : i32
    return %arg0, %c0_i32, %c0_i32_0 : i32, i32, i32
  }
  func.func @transform_7(%arg0: i32) -> (i32, i32, i32) {
    %c0_i32 = arith.constant 0 : i32
    %c0_i32_0 = arith.constant 0 : i32
    %c0_i32_1 = arith.constant 0 : i32
    return %arg0, %c0_i32, %c0_i32_0 : i32, i32, i32
  }
}

</mosaic_0001>

<bundles_post_ra>
// kernel: axis_horizontal_attention.1
= control target key start
LH: loop header
LB: loop body
LE: loop exit
PB: predicated region body
PF: predicated region fallthrough
CT: control target
= control target key end

     0   :  { %s1365_s0 = inlined_call_operand.vmem [shape: f32[2,16,64], index: 0, kind: input, shape index: {}]   ;;  %s1366_s1 = inlined_call_operand.vmem [shape: f32[48,16], index: 1, kind: input, shape index: {}]   ;;  %s1367_s2 = inlined_call_operand.<no memory space> [shape: f32[1], index: 2, kind: input, shape index: {}]   ;;  %s1368_s3 = inlined_call_operand.vmem [shape: f32[2,16,64], index: 3, kind: output, shape index: {0}]   ;;  %s1369_s4 = inlined_call_operand.hbm [shape: f32[2,16,16], index: 4, kind: output, shape index: {1}]   ;;  %s1370_s5 = inlined_call_operand.hbm [shape: f32[2,16,64], index: 5, kind: output, shape index: {2}]   ;;  %s1371_s6 = inlined_call_operand.hbm [shape: f32[2,16,64], index: 6, kind: output, shape index: {3}]   ;;  %s1372_s7 = inlined_call_operand.hbm [shape: f32[2,16,64], index: 7, kind: output, shape index: {4}]  }
   0x1   :  { %1377 = sst [smem:[#allocation16_spill]] %s1365_s0 }
   0x2   :  { %1378 = sst [smem:[#allocation17_spill]] %s1366_s1 }
   0x3   :  { %1379 = sst [smem:[#allocation18_spill]] %s1370_s5 }
   0x4   :  { %13 = sst [smem:[#allocation2]] %s1367_s2 }
   0x5   :  { %14 = vsyncpa [#allocation4], 0 }
   0x6   :  { %16 = vsyncpa [#allocation4 + $0x1], 0 }
   0x7   :  { %17 = vsyncpa [#allocation6], 0 }
   0x8   :  { %19 = vsyncpa [#allocation6 + $0x1], 0 }
   0x9   :  { %20 = vsyncpa [#allocation9], 0 }
   0xa   :  { %22 = vsyncpa [#allocation9 + $0x1], 0  ;;  %s1120_s26 = smov 0   ;;  %s1122_s27 = smov 0  }
   0xb   :  { %s1124_s28 = smov 0   ;;  %s1126_s29 = smov 0  }
   0xc LB: > { %1380 = sst [smem:[#allocation13_spill]] %s1065_s27  ;;  %s1141_s2 = sadd.s32 4294967295, %s1073_s29   ;;  %s1073_s29 = sphi %s1126_s29, %s1394_s29   ;;  %s1069_s28 = sphi %s1124_s28, %s1393_s28   ;;  %s1065_s27 = sphi %s1122_s27, %s1392_s27   ;;  %s1061_s26 = sphi %s1120_s26, %s1391_s26  }
   0xd   : > { %1381 = sst [smem:[#allocation14_spill]] %s1069_s28  ;;  %s1373_s30 = sadd.s32 4294967294, %s1073_s29  }
   0xe   : > { %s1145_s8 = sadd.s32 1, %s1073_s29   ;;  %s129_s9 = sadd.s32 1, %s1069_s28 }
   0xf   : > { %s126_s10 = ssub.s32 %s1073_s29, %s1145_s8  ;;  %p139_p0 = scmp.ne.s32.totalorder %s1069_s28, %s1065_s27 }
  0x10   : > { %p127_p1 = scmp.eq.s32.totalorder %s126_s10, 0  ;;  %p140_p2 = scmp.eq.s32.totalorder %s1141_s2, 1 }
  0x11   : > { %p145_p3 = scmp.ne.s32.totalorder %s1065_s27, %s1061_s26  ;;  %p146_p4 = scmp.eq.s32.totalorder %s1373_s30, 1 }
  0x12   : > { %s1158_s11 = scalar_select %p127_p1, %s1069_s28, %s129_s9  }
  0x13   : > { %p1160_p5 = por %p140_p2, %p139_p0  ;;  %p1164_p6 = por %p146_p4, %p145_p3 }
  0x14   : > { %1382 = sst [smem:[#allocation15_spill]] %s1158_s11  ;;  %p813_p7 = scmp.ge.s32.totalorder %s1073_s29, 1 }
  0x15   : > { %p256_p8 = scmp.lt.s32.totalorder %s1073_s29, 3 }
  0x17   : > { %p257_p9 = pnand %p813_p7, %p256_p8 }
  0x18   : > { %p308_p10 = scmp.lt.s32.totalorder (!%p257_p9), %s1141_s2, 1  ;;  %s1385_s0 = sld [smem:[#allocation16_spill]] (!%p257_p9) }
  0x19   : > { %260 = sbr.rel (%p257_p9) target bundleno = 688 (0x2b0), region = 32  ;;  %s1386_s1 = sld [smem:[#allocation17_spill]] (!%p257_p9) }
  0x1a   : > { %s1197_s10 = sand.u32 (!%p257_p9), 1, %s1065_s27   ;;  %s1251_s19 = sshll.u32 (!%p257_p9), %s1141_s2, 4 }
  0x1b   : > { %s1200_s16 = sshll.u32 (!%p257_p9), %s1197_s10, 4  ;;  %s1387_s5 = sld [smem:[#allocation18_spill]] (!%p257_p9) }
  0x1c   : > { %s1203_s17 = scalar_lea.vmem (!%p257_p9), [#allocation5], %s1200_s16  ;;  %s286_s23 = scalar_lea.vmem (!%p257_p9), [#allocation3], %s1200_s16 }
  0x1d   : > { %s1236_s24 = scalar_lea.vmem (!%p257_p9), [#allocation8], %s1200_s16  ;;  %s590_s25 = sshll.u32 (!%p257_p9), %s1203_s17, 4  ;;  %s591_s25 = int_to_ptr.vmem [resolvable:$true] %s590_s25 }
  0x1e   : > { %s1172_s14 = scalar_select %p308_p10, %s1141_s2, 1  ;;  %vm326_vm0 = vcmask 130048   ;;  %vm386_vm1 = vcmask 523264  }
  0x1f   : > { %v320_v2 = vld [vmem:[%s1386_s1] sm:$0xff]  ;;  %v323_v3 = vld [vmem:[%s1386_s1 + $0x18] sm:$0xff]  ;;  %v321_v4 = vld [vmem:[%s1386_s1 + $0x8] sm:$0xff] }
  0x20   : > { %s1374_s15 = sshll.u32 %s1172_s14, 4  ;;  %v322_v5 = vld [vmem:[%s1386_s1 + $0x10] sm:$0xff]  ;;  %v324_v38 = vld [vmem:[%s1386_s1 + $0x20] sm:$0xff]  ;;  %v325_v41 = vld [vmem:[%s1386_s1 + $0x28] sm:$0xff] }
  0x21   : > { %s312_s18 = scalar_lea.vmem %s1385_s0, %s1374_s15  ;;  %s589_s30 = scalar_lea.hbm %s1387_s5, %s1251_s19 }
  0x22   : > { %v319_v0 = vld [vmem:[%s312_s18 + $0x8] sm:$0xff]  ;;  %v318_v1 = vld [vmem:[%s312_s18] sm:$0xff]  ;;  %s1208_s18 = scalar_lea.vmem [#allocation7], %s1200_s16  ;;  %s573_s16 = sshll.u32 %s286_s23, 4  ;;  %s1248_s16 = int_to_ptr.vmem [resolvable:$true] %s573_s16 }
  0x23   : > { %359 = vmatpush.msra.mxu0 %v319_v0  ;;  %854 = vmatpush.msra.mxu3 %v319_v0  ;;  %s607_s9 = sshll.u32 %s1208_s18, 4  ;;  %s939_s20 = scalar_lea.hbm %s1387_s5, 32  ;;  %s1246_s9 = int_to_ptr.vmem [resolvable:$true] %s607_s9 }
  0x25   : > { %360 = vmatpush.msra.mxu0 %v318_v1  ;;  %855 = vmatpush.msra.mxu3 %v318_v1 }
  0x26   : > { %822 = vmatmul.msk.f32.vlgmr.msra.gmra.mxu0 %vm326_vm0, %v320_v2  ;;  %825 = vmatmul.msk.f32.vlgmr.msra.gmra.mxu3 %vm326_vm0, %v323_v3 }
  0x2e   : > { %823 = vmatmul.msk.f32.gmra.mxu0 %vm326_vm0, %v321_v4  ;;  %826 = vmatmul.msk.f32.gmra.mxu3 %vm326_vm0, %v324_v38 }
  0x36   : > { %824 = vmatmul.msk.f32.gmra.mxu0 %vm326_vm0, %v322_v5  ;;  %827 = vmatmul.msk.f32.gmra.mxu3 %vm326_vm0, %v325_v41 }
  0xa3   : > { %v362_v6 = vpop.f32.mrf.mxu0 }
  0xa4   : > { %v380_v7 = vmax.f32 %v362_v6, 0.0 }
  0xa6   : > { %531 = vst.msk [vmem:[%s1203_s17] sm:$0xff] %vm386_vm1, %v380_v7 }
  0xa9   : > { %v371_v8 = vpop.f32.mrf.mxu3 }
  0xaa   : > { %v383_v9 = vmax.f32 %v371_v8, 0.0 }
  0xab   : > { %v365_v10 = vpop.f32.mrf.mxu0 }
  0xac   : > { %v381_v11 = vmax.f32 %v365_v10, 0.0  ;;  %534 = vst.msk [vmem:[%s1208_s18 + $0x8] sm:$0xff] %vm386_vm1, %v383_v9  ;;  %828 = vmatpush.xpose.msk.msra.mxu1 %vm386_vm1, %v383_v9 }
  0xae   : > { %532 = vst.msk [vmem:[%s1203_s17 + $0x8] sm:$0xff] %vm386_vm1, %v381_v11  ;;  %s547_s17 = sand.u32 1, %s1141_s2  }
  0xb1   : > { %v374_v54 = vpop.f32.mrf.mxu3 }
  0xb2   : > { %v384_v55 = vmax.f32 %v374_v54, 0.0 }
  0xb3   : > { %v368_v12 = vpop.f32.mrf.mxu0 }
  0xb4   : > { %v382_v13 = vmax.f32 %v368_v12, 0.0  ;;  %535 = vst.msk [vmem:[%s1236_s24] sm:$0xff] %vm386_vm1, %v384_v55 }
  0xb6   : > { %533 = vst.msk [vmem:[%s1208_s18] sm:$0xff] %vm386_vm1, %v382_v13  ;;  %829 = vmatpush.xpose.msk.msra.mxu1 %vm386_vm1, %v382_v13  ;;  %s592_s18 = sshll.u32 %s589_s30, 4  ;;  %s593_s18 = int_to_ptr.hbm [resolvable:$true] %s592_s18 }
  0xb7   : > { %s933_s15 = sshra.s32 %s593_s18, 4  ;;  %s934_s15 = int_to_ptr.hbm [resolvable:$true] %s933_s15 }
  0xb8   : > { %s935_s0 = scalar_lea.hbm %s934_s15, 16  ;;  %p940_p0 = scmp.lt.s32.totalorder %s934_s15, %s1387_s5 }
  0xb9   : > { %830 = vmatmul.msk.f32.vlgmr.msra.gmra.mxu1 %vm386_vm1, %v380_v7  ;;  %v377_v56 = vpop.f32.mrf.mxu3  ;;  %p936_p11 = scmp.ne.s32.totalorder %s934_s15, %s935_s0  ;;  %p941_p1 = scmp.lt.s32.totalorder %s939_s20, %s935_s0 }
  0xba   : > { %v385_v57 = vmax.f32 %v377_v56, 0.0 }
  0xbb   : > { %p937_p12 = pnand %p936_p11, %p1160_p5  ;;  %p942_p2 = por %p941_p1, %p940_p0 }
  0xbc   : > { %536 = vst.msk [vmem:[%s1236_s24 + $0x8] sm:$0xff] %vm386_vm1, %v385_v57  ;;  %514 = vmatpush.msra.mxu2 %v385_v57 }
  0xbd   : > { %p938_p13 = pneg %p937_p12 }
  0xbe   : > { %515 = vmatpush.msra.mxu2 %v384_v55 }
  0xbf   : > { %p943_p3 = pnand %p942_p2, %p938_p13 }
  0xc1   : > { %831 = vmatmul.msk.f32.gmra.mxu1 %vm386_vm1, %v381_v11 }
 0x136   : > { %v416_v14 = vpop.f32.mrf.mxu1 }
 0x137   : > { %v422_v16 = vsel %vm326_vm0, %v416_v14, -inf }
 0x13e   : > { %v419_v15 = vpop.f32.mrf.mxu1 }
 0x13f   : > { %v423_v17 = vsel %vm326_vm0, %v419_v15, -inf }
 0x140   : > { %v424_v18 = vmax.f32 %v422_v16, %v423_v17 }
 0x142   : > { %v425_v19 = vrot.slane %v424_v18, 4 }
 0x144   : > { %v426_v20 = vmax.f32 %v424_v18, %v425_v19 }
 0x146   : > { %v427_v21 = vrot.slane %v426_v20, 2 }
 0x148   : > { %v428_v22 = vmax.f32 %v426_v20, %v427_v21 }
 0x14a   : > { %v429_v23 = vrot.slane %v428_v22, 1 }
 0x14c   : > { %v430_v24 = vmax.f32 %v428_v22, %v429_v23 }
 0x14e   : > { %v431_v25 = vsub.f32 %v416_v14, %v430_v24  ;;  %v432_v26 = vsub.f32 %v419_v15, %v430_v24 }
 0x150   : > { %v433_v27 = vmul.f32 1.442695, %v431_v25  ;;  %v435_v28 = vmul.f32 1.442695, %v432_v26 }
 0x152   : > { %913 = vpow2.f32 %v433_v27 }
 0x153   : > { %915 = vpow2.f32 %v435_v28 }
 0x158   : > { %v914_v29 = vpop.eup %913 }
 0x159   : > { %v916_v30 = vpop.eup %915  ;;  %v437_v31 = vsel %vm326_vm0, %v914_v29, 0.0 }
 0x15a   : > { %v438_v32 = vsel %vm326_vm0, %v916_v30, 0.0 }
 0x15b   : > { %v439_v33 = vadd.f32 %v438_v32, %v437_v31 }
 0x15d   : > { %v440_v34 = vrot.slane %v439_v33, 4 }
 0x15f   : > { %v441_v35 = vadd.f32 %v440_v34, %v439_v33 }
 0x161   : > { %v442_v36 = vrot.slane %v441_v35, 2 }
 0x163   : > { %v443_v37 = vadd.f32 %v442_v36, %v441_v35 }
 0x165   : > { %v444_v39 = vrot.slane %v443_v37, 1 }
 0x167   : > { %v445_v40 = vadd.f32 %v444_v39, %v443_v37 }
 0x169   : > { %917 = vrcp.f32 %v445_v40  ;;  %v457_v45 = vand.u32 2147483648, %v445_v40  ;;  %v455_v47 = vand.u32 2147483647, %v445_v40  ;;  %vm451_vm3 = vweird.f32 %v445_v40 }
 0x16b   : > { %v458_v49 = vor.u32 1.1754944e-38, %v457_v45  ;;  %vm456_vm5 = vcmp.eq.f32.partialorder %v455_v47, 8.507059e+37 }
 0x16f   : > { %v918_v42 = vpop.eup %917 }
 0x170   : > { %v447_v43 = vmul.f32 %v918_v42, %v445_v40  ;;  %vm452_vm2 = vweird.f32 %v918_v42 }
 0x171   : > { %vm453_vm4 = vmor %vm451_vm3, %vm452_vm2 }
 0x172   : > { %v448_v44 = vsub.f32 1.0, %v447_v43 }
 0x174   : > { %v449_v46 = vmul.f32 %v918_v42, %v448_v44 }
 0x176   : > { %v450_v48 = vadd.f32 %v918_v42, %v449_v46 }
 0x178   : > { %v454_v50 = vsel %vm453_vm4, %v918_v42, %v450_v48 }
 0x179   : > { %v459_v51 = vsel %vm456_vm5, %v458_v49, %v454_v50 }
 0x17a   : > { %v460_v52 = vmul.f32 %v914_v29, %v459_v51  ;;  %v461_v53 = vmul.f32 %v916_v30, %v459_v51 }
 0x17c   : > { %462 = vxpose.xlu0.b32.start [1/2] (short) (narrow) %v460_v52, 16  ;;  %529 = vst.msk [vmem:[%s286_s23] sm:$0xff] %vm326_vm0, %v460_v52 }
 0x17d   : > { %530 = vst.msk [vmem:[%s286_s23 + $0x8] sm:$0xff] %vm326_vm0, %v461_v53  ;;  %s1259_s23 = scalar_lea.sflag [#allocation6], %s547_s17 }
 0x184   : > { %463 = vxpose.xlu0.b32.end [2/2] (short) (narrow) %v461_v53, 16 }
 0x220   : > { %v478_v58 = vpop.trf.xlu0 }
 0x221   : > { %832 = vmatmul.msk.f32.vlgmr.msra.gmra.mxu2 %vm326_vm0, %v478_v58 }
 0x228   : > { %v479_v59 = vpop.trf.xlu0 }
 0x229   : > { %833 = vmatmul.msk.f32.gmra.mxu2 %vm326_vm0, %v479_v59 }
 0x22a   : > { %946 = shalt.err (!%p943_p3)
}
 0x22b   : > { %s1075_s2 = smov 128   ;;  %s1076_s30 = smov 8  }
 0x22c   : > { %857 = dma.vmem_to_hbm [thread:$0]  (%p1160_p5), %s591_s25, 256, %s593_s18, %s1259_s23, %s1075_s2, %s1075_s2, %s1076_s30  }
 0x22d   : > { %s572_s0 = scalar_lea.hbm %s1369_s4, %s1251_s19  ;;  %s606_s20 = scalar_lea.hbm %s1371_s6, %s1251_s19 }
 0x22e   : > { %s575_s28 = sshll.u32 %s572_s0, 4  ;;  %s1283_s21 = sshll.u32 %s606_s20, 4  ;;  %s576_s28 = int_to_ptr.hbm [resolvable:$true] %s575_s28  ;;  %s610_s21 = int_to_ptr.hbm [resolvable:$true] %s1283_s21 }
 0x22f   : > { %s543_s22 = scalar_lea.sflag [#allocation4], %s1197_s10  ;;  %s961_s17 = sshra.s32 %s576_s28, 4  ;;  %s962_s17 = int_to_ptr.hbm [resolvable:$true] %s961_s17 }
 0x230   : > { %s963_s5 = scalar_lea.hbm %s962_s17, 16  ;;  %s967_s1 = scalar_lea.hbm %s1369_s4, 32 }
 0x231   : > { %p964_p4 = scmp.ne.s32.totalorder %s962_s17, %s963_s5  ;;  %p968_p9 = scmp.lt.s32.totalorder %s962_s17, %s1369_s4 }
 0x232   : > { %p969_p10 = scmp.lt.s32.totalorder %s967_s1, %s963_s5 }
 0x233   : > { %p965_p7 = pnand %p964_p4, %p1160_p5 }
 0x234   : > { %p970_p11 = por %p969_p10, %p968_p9 }
 0x235   : > { %p966_p8 = pneg %p965_p7 }
 0x237   : > { %p971_p12 = pnand %p970_p11, %p966_p8 }
 0x239   : > { %974 = shalt.err (!%p971_p12)
}
 0x23a   : > { %856 = dma.vmem_to_hbm [thread:$0]  (%p1160_p5), %s1248_s16, 256, %s576_s28, %s543_s22, %s1075_s2, %s1075_s2, %s1076_s30  }
 0x23b   : > { %s1388_s11 = sshll.u32 %s1236_s24, 4  ;;  %s989_s15 = sshra.s32 %s610_s21, 4  ;;  %s1302_s11 = int_to_ptr.vmem [resolvable:$true] %s1388_s11  ;;  %s990_s15 = int_to_ptr.hbm [resolvable:$true] %s989_s15 }
 0x23c   : > { %s991_s5 = scalar_lea.hbm %s990_s15, 16  ;;  %s995_s25 = scalar_lea.hbm %s1371_s6, 32 }
 0x23d   : > { %p992_p13 = scmp.ne.s32.totalorder %s990_s15, %s991_s5  ;;  %p996_p2 = scmp.lt.s32.totalorder %s990_s15, %s1371_s6 }
 0x23e   : > { %p997_p3 = scmp.lt.s32.totalorder %s995_s25, %s991_s5 }
 0x23f   : > { %p993_p0 = pnand %p992_p13, %p1160_p5 }
 0x240   : > { %p998_p4 = por %p997_p3, %p996_p2 }
 0x241   : > { %p994_p1 = pneg %p993_p0 }
 0x243   : > { %p999_p7 = pnand %p998_p4, %p994_p1 }
 0x245   : > { %1002 = shalt.err (!%p999_p7)
}
 0x246   : > { %858 = dma.vmem_to_hbm [thread:$0]  (%p1160_p5), %s1246_s9, 256, %s610_s21, %s1259_s23, %s1075_s2, %s1075_s2, %s1076_s30  }
 0x247   : > { %s623_s28 = scalar_lea.hbm %s1372_s7, %s1251_s19  ;;  %s558_s27 = scalar_lea.sflag [#allocation9], %s1197_s10 }
 0x248   : > { %s626_s22 = sshll.u32 %s623_s28, 4  ;;  %s1023_s17 = scalar_lea.hbm %s1372_s7, 32  ;;  %s627_s22 = int_to_ptr.hbm [resolvable:$true] %s626_s22 }
 0x249   : > { %s1017_s0 = sshra.s32 %s627_s22, 4  ;;  %s1018_s0 = int_to_ptr.hbm [resolvable:$true] %s1017_s0 }
 0x24a   : > { %s1019_s15 = scalar_lea.hbm %s1018_s0, 16  ;;  %p1024_p11 = scmp.lt.s32.totalorder %s1018_s0, %s1372_s7 }
 0x24b   : > { %p1020_p8 = scmp.ne.s32.totalorder %s1018_s0, %s1019_s15  ;;  %p1025_p12 = scmp.lt.s32.totalorder %s1023_s17, %s1019_s15 }
 0x24d   : > { %p1021_p9 = pnand %p1020_p8, %p1160_p5  ;;  %p1026_p13 = por %p1025_p12, %p1024_p11 }
 0x24f   : > { %p1022_p10 = pneg %p1021_p9 }
 0x251   : > { %p1027_p0 = pnand %p1026_p13, %p1022_p10 }
 0x253   : > { %1030 = shalt.err (!%p1027_p0)
}
 0x254   : > { %859 = dma.vmem_to_hbm [thread:$0]  (%p1160_p5), %s1302_s11, 256, %s627_s22, %s558_s27, %s1075_s2, %s1075_s2, %s1076_s30  }
 0x255   : > { %s523_s10 = sld [smem:[#allocation2]]  ;;  %s1389_s19 = sshll.u32 %s1172_s14, 4 }
 0x256   : > { %s317_s18 = scalar_lea.vmem %s1368_s3, %s1389_s19 }
 0x25b   : > { %v524_v60 = vstv %s523_s10 }
 0x2a4   : > { %v517_v61 = vpop.f32.mrf.mxu2 }
 0x2a5   : > { %v525_v62 = vmul.f32 %v524_v60, %v517_v61 }
 0x2a7   : > { %527 = vst.msk [vmem:[%s317_s18] sm:$0xff] %vm386_vm1, %v525_v62 }
 0x2ac   : > { %v520_v63 = vpop.f32.mrf.mxu2 }
 0x2ad   : > { %v526_v0 = vmul.f32 %v524_v60, %v520_v63 }
 0x2af   : > { %528 = vst.msk [vmem:[%s317_s18 + $0x8] sm:$0xff] %vm386_vm1, %v526_v0 }
 0x2b0 PF: > { %p877_p5 = scmp.ge.s32.totalorder %s1073_s29, 2  ;;  %s649_s12 = sand.u32 1, %s1061_s26  }
 0x2b1   : > { %s650_s14 = scalar_lea.sflag [#allocation4], %s649_s12 }
 0x2b2   : > { %p865_p1 = pnand %p877_p5, %p1164_p6 }
 0x2b4   : > { %p866_p2 = pneg %p865_p1 }
 0x2b6   : > { %1048 = dma.done.wait (%p866_p2), %s650_s14, 256  }
 0x2b7   : > { %1050 = vsyncadd (%p866_p2), %s650_s14, 4294967040  ;;  %s1390_s2 = sadd.s32 4294967294, %s1073_s29  }
 0x2b8   : > { %s659_s30 = sand.u32 1, %s1390_s2  }
 0x2b9   : > { %s660_s11 = scalar_lea.sflag [#allocation6], %s659_s30 }
 0x2ba   : > { %1052 = dma.done.wait (%p866_p2), %s660_s11, 512  }
 0x2bb   : > { %1054 = vsyncadd (%p866_p2), %s660_s11, 4294966784  ;;  %s680_s1 = scalar_lea.sflag [#allocation9], %s649_s12 }
 0x2bc   : > { %1056 = dma.done.wait (%p866_p2), %s680_s1, 256  }
 0x2bd   : > { %1058 = vsyncadd (%p866_p2), %s680_s1, 4294967040  ;;  %s1391_s26 = sld [smem:[#allocation13_spill]]  ;;  %p25_p3 = scmp.ge.s32.totalorder %s1145_s8, 4  }
 0x2be   : > { %s1392_s27 = sld [smem:[#allocation14_spill]]  ;;  %s1394_s29 = smov %s1145_s8 }
 0x2bf   : > { %s1393_s28 = sld [smem:[#allocation15_spill]]  ;;  %27 = sbr.rel (!%p25_p3) target bundleno = 12 (0xc), region = 128 }
 0x2c4   :  { %686 = vsyncpa [#allocation4], 1 }
 0x2c5   :  { %688 = vsyncpa [#allocation4 + $0x1], 1 }
 0x2c6   :  { %689 = vsyncpa [#allocation6], 1 }
 0x2c7   :  { %691 = vsyncpa [#allocation6 + $0x1], 1 }
 0x2c8   :  { %692 = vsyncpa [#allocation9], 1 }
 0x2c9   :  { %694 = vsyncpa [#allocation9 + $0x1], 1 }

</bundles_post_ra>
